<compile_context>
chip_gen: v7x
topology: tpu7x:2x2x1
jax: 0.10.0
libtpu: 0.0.40
codegen_flags: <defaults>
</compile_context>

<pallas_src>
import functools

import jax
import jax.numpy as jnp
from jax.experimental import pallas as pl
from jax.experimental.pallas import tpu as pltpu

EPS = 1e-8
LANE = 128


def _round_up(x, m):
    return (x + m - 1) // m * m


def _silu(x):
    return x * jax.nn.sigmoid(x)


def _rms_norm_rows(h, d):
    """SimpleRMSNorm with features on the sublane (first) axis.

    h: (d, tm).  Sum of squares is d explicit row adds (d is tiny/static),
    avoiding an XLU reduction over a 128-lane vreg with only d valid rows.
    """
    sq = h * h
    ss = sq[0:1, :]
    for i in range(1, d):
        ss = ss + sq[i:i + 1, :]
    rms = jnp.sqrt(ss) * (float(d) ** -0.5)          # (1, tm)
    return h * (1.0 / (rms + EPS))                   # broadcast over sublanes


def _matvec_rows(wt_ref, h, d):
    """Contraction sum_i W[i, o] * h[i, n] as unrolled VPU broadcast FMAs.

    wt_ref: (out, d) VMEM ref holding W.T;  h: (d, tm)  ->  (out, tm).
    """
    acc = wt_ref[:, 0:1] * h[0:1, :]
    for i in range(1, d):
        acc = acc + wt_ref[:, i:i + 1] * h[i:i + 1, :]
    return acc


def _dpb_kernel(x_ref, w0_ref, b0_ref, w1_ref, b1_ref, w2_ref, b2_ref, o_ref,
                *, pos_dim):
    # x_ref: (1, tm), N on lanes.  All weights are tiny VMEM-resident tiles
    # stored transposed: w0 (pos_dim,1), b0 (pos_dim,1), w1 (pos_dim,pos_dim),
    # b1 (pos_dim,1), w2 (num_heads,pos_dim), b2 (num_heads,1).
    x = x_ref[...].astype(jnp.float32)                       # (1, tm)

    # pos_proj: Linear(1 -> pos_dim) == broadcast multiply-add (K=1, no MXU).
    h0 = w0_ref[...] * x + b0_ref[...]                       # (pos_dim, tm)

    # pos1: SimpleRMSNorm -> SiLU -> Linear(pos_dim -> pos_dim)
    g1 = _silu(_rms_norm_rows(h0, pos_dim))
    h1 = _matvec_rows(w1_ref, g1, pos_dim) + b1_ref[...]     # (pos_dim, tm)

    # pos2: SimpleRMSNorm -> SiLU -> Linear(pos_dim -> num_heads)
    g2 = _silu(_rms_norm_rows(h1, pos_dim))
    out = _matvec_rows(w2_ref, g2, pos_dim) + b2_ref[...]    # (num_heads, tm)

    o_ref[...] = out.astype(o_ref.dtype)


def dynamic_pos_bias_v3(biases, params, *, num_heads, pos_dim, max_tm=1024):
    """biases: (N, 1) f32.  params: (in,out)-layout weights + (1,out) biases."""
    N = biases.shape[0]

    # Pad N up to a lane-aligned tile; pad rows are zeros (finite through
    # RMSNorm/SiLU thanks to eps) and are sliced off afterwards.
    n_pad = _round_up(N, LANE)
    tm = min(max_tm, n_pad)
    n_pad = _round_up(n_pad, tm)
    grid = (n_pad // tm,)

    # Transpose so N is the lane axis.
    x_t = jnp.zeros((1, n_pad), jnp.float32)
    x_t = x_t.at[0, :N].set(biases[:, 0].astype(jnp.float32))

    # Transposed weight layout for the kernel (features on sublanes).
    w0t = params["w0"].T          # (pos_dim, 1)
    b0t = params["b0"].T          # (pos_dim, 1)
    w1t = params["w1"].T          # (pos_dim, pos_dim)   w1t[o, i] = W1[i, o]
    b1t = params["b1"].T          # (pos_dim, 1)
    w2t = params["w2"].T          # (num_heads, pos_dim)
    b2t = params["b2"].T          # (num_heads, 1)

    full = lambda a: pl.BlockSpec(a.shape, lambda i: (0, 0))
    kernel = functools.partial(_dpb_kernel, pos_dim=pos_dim)

    out_t = pl.pallas_call(
        kernel,
        out_shape=jax.ShapeDtypeStruct((num_heads, n_pad), jnp.float32),
        grid_spec=pl.GridSpec(
            grid=grid,
            in_specs=[
                pl.BlockSpec((1, tm), lambda i: (0, i)),     # biases (lane-dense)
                full(w0t), full(b0t),
                full(w1t), full(b1t),
                full(w2t), full(b2t),
            ],
            out_specs=pl.BlockSpec((num_heads, tm), lambda i: (0, i)),
        ),
        compiler_params=pltpu.CompilerParams(
            dimension_semantics=("parallel",)),
    )(x_t, w0t, b0t, w1t, b1t, w2t, b2t)

    return out_t[:, :N].T                                    # (N, num_heads)


def init_params(key, pos_dim, num_heads):
    """Deterministic nn.Linear-style init: U(-1/sqrt(fan_in), 1/sqrt(fan_in)).
    Weights stored as (in_features, out_features)."""
    ks = jax.random.split(key, 6)

    def lin(kw, kb, fan_in, fan_out):
        bound = 1.0 / jnp.sqrt(float(fan_in))
        w = jax.random.uniform(kw, (fan_in, fan_out), jnp.float32, -bound, bound)
        b = jax.random.uniform(kb, (1, fan_out), jnp.float32, -bound, bound)
        return w, b

    w0, b0 = lin(ks[0], ks[1], 1, pos_dim)
    w1, b1 = lin(ks[2], ks[3], pos_dim, pos_dim)
    w2, b2 = lin(ks[4], ks[5], pos_dim, num_heads)
    return {"w0": w0, "b0": b0, "w1": w1, "b1": b1, "w2": w2, "b2": b2}


def _ref_rms_norm(x, d):
    norm = jnp.sqrt(jnp.sum(x * x, axis=-1, keepdims=True))
    rms = norm * (float(d) ** -0.5)
    return x / (rms + EPS)


def reference(biases, p, pos_dim):
    h0 = biases @ p["w0"] + p["b0"]
    h1 = _silu(_ref_rms_norm(h0, pos_dim)) @ p["w1"] + p["b1"]
    return _silu(_ref_rms_norm(h1, pos_dim)) @ p["w2"] + p["b2"]


if __name__ == "__main__":
    dim = 32
    num_heads = 8
    pos_dim = dim // 8          # = 4
    N = 64                      # number of relative-position entries

    key = jax.random.PRNGKey(0)
    k_bias, k_param = jax.random.split(key)

    # Relative position offsets as a (N, 1) float tensor (as the module expects).
    biases = jax.random.normal(k_bias, (N, 1), jnp.float32) * 4.0
    params = init_params(k_param, pos_dim, num_heads)

    out = dynamic_pos_bias_v3(biases, params, num_heads=num_heads,
                              pos_dim=pos_dim)
    out = jax.block_until_ready(out)

    ref = reference(biases, params, pos_dim)
    assert out.shape == (N, num_heads)
    assert jnp.allclose(out, ref, atol=1e-5, rtol=1e-5)

    print("KERNEL_OK")
</pallas_src>

<mosaic_0001>
module attributes {stable_mosaic.version = 11 : i64} {
  func.func @_dpb_kernel(%arg0: i32, %arg1: memref<1x128xf32, #tpu.memory_space<vmem>>, %arg2: memref<4x1xf32, #tpu.memory_space<vmem>>, %arg3: memref<4x1xf32, #tpu.memory_space<vmem>>, %arg4: memref<4x4xf32, #tpu.memory_space<vmem>>, %arg5: memref<4x1xf32, #tpu.memory_space<vmem>>, %arg6: memref<8x4xf32, #tpu.memory_space<vmem>>, %arg7: memref<8x1xf32, #tpu.memory_space<vmem>>, %arg8: memref<8x128xf32, #tpu.memory_space<vmem>>) attributes {dimension_semantics = [#tpu.dimension_semantics<parallel>], iteration_bounds = array<i64: 1>, scalar_prefetch = 0 : i64, scratch_operands = 0 : i64, tpu.core_type = #tpu.core_type<tc>, window_params = [{transform_indices = @transform_0, window_bounds = array<i64: 1, 128>}, {pipeline_mode = #tpu.pipeline_mode<synchronous>, transform_indices = @transform_1, window_bounds = array<i64: 4, 1>}, {pipeline_mode = #tpu.pipeline_mode<synchronous>, transform_indices = @transform_2, window_bounds = array<i64: 4, 1>}, {pipeline_mode = #tpu.pipeline_mode<synchronous>, transform_indices = @transform_3, window_bounds = array<i64: 4, 4>}, {pipeline_mode = #tpu.pipeline_mode<synchronous>, transform_indices = @transform_4, window_bounds = array<i64: 4, 1>}, {pipeline_mode = #tpu.pipeline_mode<synchronous>, transform_indices = @transform_5, window_bounds = array<i64: 8, 4>}, {pipeline_mode = #tpu.pipeline_mode<synchronous>, transform_indices = @transform_6, window_bounds = array<i64: 8, 1>}, {transform_indices = @transform_7, window_bounds = array<i64: 8, 128>}]} {
    %c0 = arith.constant 0 : index
    %c0_0 = arith.constant 0 : index
    %0 = vector.load %arg1[%c0, %c0_0] : memref<1x128xf32, #tpu.memory_space<vmem>>, vector<1x128xf32>
    %c0_1 = arith.constant 0 : index
    %c0_2 = arith.constant 0 : index
    %1 = vector.load %arg2[%c0_1, %c0_2] : memref<4x1xf32, #tpu.memory_space<vmem>>, vector<4x1xf32>
    %2 = vector.broadcast %1 : vector<4x1xf32> to vector<4x128xf32>
    %3 = vector.broadcast %0 : vector<1x128xf32> to vector<4x128xf32>
    %4 = arith.mulf %2, %3 : vector<4x128xf32>
    %c0_3 = arith.constant 0 : index
    %c0_4 = arith.constant 0 : index
    %5 = vector.load %arg3[%c0_3, %c0_4] : memref<4x1xf32, #tpu.memory_space<vmem>>, vector<4x1xf32>
    %6 = vector.broadcast %5 : vector<4x1xf32> to vector<4x128xf32>
    %7 = arith.addf %4, %6 : vector<4x128xf32>
    %8 = arith.mulf %7, %7 : vector<4x128xf32>
    %9 = vector.extract_strided_slice %8 {offsets = [0, 0], sizes = [1, 128], strides = [1, 1]} : vector<4x128xf32> to vector<1x128xf32>
    %10 = vector.extract_strided_slice %8 {offsets = [1, 0], sizes = [1, 128], strides = [1, 1]} : vector<4x128xf32> to vector<1x128xf32>
    %11 = arith.addf %9, %10 : vector<1x128xf32>
    %12 = vector.extract_strided_slice %8 {offsets = [2, 0], sizes = [1, 128], strides = [1, 1]} : vector<4x128xf32> to vector<1x128xf32>
    %13 = arith.addf %11, %12 : vector<1x128xf32>
    %14 = vector.extract_strided_slice %8 {offsets = [3, 0], sizes = [1, 128], strides = [1, 1]} : vector<4x128xf32> to vector<1x128xf32>
    %15 = arith.addf %13, %14 : vector<1x128xf32>
    %16 = math.sqrt %15 : vector<1x128xf32>
    %cst = arith.constant 5.000000e-01 : f32
    %17 = vector.broadcast %cst : f32 to vector<1x128xf32>
    %18 = arith.mulf %16, %17 : vector<1x128xf32>
    %cst_5 = arith.constant 9.99999993E-9 : f32
    %19 = vector.broadcast %cst_5 : f32 to vector<1x128xf32>
    %20 = arith.addf %18, %19 : vector<1x128xf32>
    %cst_6 = arith.constant 1.000000e+00 : f32
    %21 = vector.broadcast %cst_6 : f32 to vector<1x128xf32>
    %22 = arith.divf %21, %20 : vector<1x128xf32>
    %23 = vector.broadcast %22 : vector<1x128xf32> to vector<4x128xf32>
    %24 = arith.mulf %7, %23 : vector<4x128xf32>
    %25 = arith.negf %24 : vector<4x128xf32>
    %26 = math.exp %25 : vector<4x128xf32>
    %cst_7 = arith.constant 1.000000e+00 : f32
    %27 = vector.broadcast %cst_7 : f32 to vector<4x128xf32>
    %28 = arith.addf %27, %26 : vector<4x128xf32>
    %29 = arith.divf %27, %28 : vector<4x128xf32>
    %30 = arith.mulf %24, %29 : vector<4x128xf32>
    %c0_8 = arith.constant 0 : index
    %c0_9 = arith.constant 0 : index
    %31 = vector.load %arg4[%c0_8, %c0_9] : memref<4x4xf32, #tpu.memory_space<vmem>>, vector<4x1xf32>
    %32 = vector.extract_strided_slice %30 {offsets = [0, 0], sizes = [1, 128], strides = [1, 1]} : vector<4x128xf32> to vector<1x128xf32>
    %33 = vector.broadcast %31 : vector<4x1xf32> to vector<4x128xf32>
    %34 = vector.broadcast %32 : vector<1x128xf32> to vector<4x128xf32>
    %35 = arith.mulf %33, %34 : vector<4x128xf32>
    %c0_10 = arith.constant 0 : index
    %c1 = arith.constant 1 : index
    %36 = vector.load %arg4[%c0_10, %c1] : memref<4x4xf32, #tpu.memory_space<vmem>>, vector<4x1xf32>
    %37 = vector.extract_strided_slice %30 {offsets = [1, 0], sizes = [1, 128], strides = [1, 1]} : vector<4x128xf32> to vector<1x128xf32>
    %38 = vector.broadcast %36 : vector<4x1xf32> to vector<4x128xf32>
    %39 = vector.broadcast %37 : vector<1x128xf32> to vector<4x128xf32>
    %40 = arith.mulf %38, %39 : vector<4x128xf32>
    %41 = arith.addf %35, %40 : vector<4x128xf32>
    %c0_11 = arith.constant 0 : index
    %c2 = arith.constant 2 : index
    %42 = vector.load %arg4[%c0_11, %c2] : memref<4x4xf32, #tpu.memory_space<vmem>>, vector<4x1xf32>
    %43 = vector.extract_strided_slice %30 {offsets = [2, 0], sizes = [1, 128], strides = [1, 1]} : vector<4x128xf32> to vector<1x128xf32>
    %44 = vector.broadcast %42 : vector<4x1xf32> to vector<4x128xf32>
    %45 = vector.broadcast %43 : vector<1x128xf32> to vector<4x128xf32>
    %46 = arith.mulf %44, %45 : vector<4x128xf32>
    %47 = arith.addf %41, %46 : vector<4x128xf32>
    %c0_12 = arith.constant 0 : index
    %c3 = arith.constant 3 : index
    %48 = vector.load %arg4[%c0_12, %c3] : memref<4x4xf32, #tpu.memory_space<vmem>>, vector<4x1xf32>
    %49 = vector.extract_strided_slice %30 {offsets = [3, 0], sizes = [1, 128], strides = [1, 1]} : vector<4x128xf32> to vector<1x128xf32>
    %50 = vector.broadcast %48 : vector<4x1xf32> to vector<4x128xf32>
    %51 = vector.broadcast %49 : vector<1x128xf32> to vector<4x128xf32>
    %52 = arith.mulf %50, %51 : vector<4x128xf32>
    %53 = arith.addf %47, %52 : vector<4x128xf32>
    %c0_13 = arith.constant 0 : index
    %c0_14 = arith.constant 0 : index
    %54 = vector.load %arg5[%c0_13, %c0_14] : memref<4x1xf32, #tpu.memory_space<vmem>>, vector<4x1xf32>
    %55 = vector.broadcast %54 : vector<4x1xf32> to vector<4x128xf32>
    %56 = arith.addf %53, %55 : vector<4x128xf32>
    %57 = arith.mulf %56, %56 : vector<4x128xf32>
    %58 = vector.extract_strided_slice %57 {offsets = [0, 0], sizes = [1, 128], strides = [1, 1]} : vector<4x128xf32> to vector<1x128xf32>
    %59 = vector.extract_strided_slice %57 {offsets = [1, 0], sizes = [1, 128], strides = [1, 1]} : vector<4x128xf32> to vector<1x128xf32>
    %60 = arith.addf %58, %59 : vector<1x128xf32>
    %61 = vector.extract_strided_slice %57 {offsets = [2, 0], sizes = [1, 128], strides = [1, 1]} : vector<4x128xf32> to vector<1x128xf32>
    %62 = arith.addf %60, %61 : vector<1x128xf32>
    %63 = vector.extract_strided_slice %57 {offsets = [3, 0], sizes = [1, 128], strides = [1, 1]} : vector<4x128xf32> to vector<1x128xf32>
    %64 = arith.addf %62, %63 : vector<1x128xf32>
    %65 = math.sqrt %64 : vector<1x128xf32>
    %cst_15 = arith.constant 5.000000e-01 : f32
    %66 = vector.broadcast %cst_15 : f32 to vector<1x128xf32>
    %67 = arith.mulf %65, %66 : vector<1x128xf32>
    %cst_16 = arith.constant 9.99999993E-9 : f32
    %68 = vector.broadcast %cst_16 : f32 to vector<1x128xf32>
    %69 = arith.addf %67, %68 : vector<1x128xf32>
    %cst_17 = arith.constant 1.000000e+00 : f32
    %70 = vector.broadcast %cst_17 : f32 to vector<1x128xf32>
    %71 = arith.divf %70, %69 : vector<1x128xf32>
    %72 = vector.broadcast %71 : vector<1x128xf32> to vector<4x128xf32>
    %73 = arith.mulf %56, %72 : vector<4x128xf32>
    %74 = arith.negf %73 : vector<4x128xf32>
    %75 = math.exp %74 : vector<4x128xf32>
    %cst_18 = arith.constant 1.000000e+00 : f32
    %76 = vector.broadcast %cst_18 : f32 to vector<4x128xf32>
    %77 = arith.addf %76, %75 : vector<4x128xf32>
    %78 = arith.divf %76, %77 : vector<4x128xf32>
    %79 = arith.mulf %73, %78 : vector<4x128xf32>
    %c0_19 = arith.constant 0 : index
    %c0_20 = arith.constant 0 : index
    %80 = vector.load %arg6[%c0_19, %c0_20] : memref<8x4xf32, #tpu.memory_space<vmem>>, vector<8x1xf32>
    %81 = vector.extract_strided_slice %79 {offsets = [0, 0], sizes = [1, 128], strides = [1, 1]} : vector<4x128xf32> to vector<1x128xf32>
    %82 = vector.broadcast %80 : vector<8x1xf32> to vector<8x128xf32>
    %83 = vector.broadcast %81 : vector<1x128xf32> to vector<8x128xf32>
    %84 = arith.mulf %82, %83 : vector<8x128xf32>
    %c0_21 = arith.constant 0 : index
    %c1_22 = arith.constant 1 : index
    %85 = vector.load %arg6[%c0_21, %c1_22] : memref<8x4xf32, #tpu.memory_space<vmem>>, vector<8x1xf32>
    %86 = vector.extract_strided_slice %79 {offsets = [1, 0], sizes = [1, 128], strides = [1, 1]} : vector<4x128xf32> to vector<1x128xf32>
    %87 = vector.broadcast %85 : vector<8x1xf32> to vector<8x128xf32>
    %88 = vector.broadcast %86 : vector<1x128xf32> to vector<8x128xf32>
    %89 = arith.mulf %87, %88 : vector<8x128xf32>
    %90 = arith.addf %84, %89 : vector<8x128xf32>
    %c0_23 = arith.constant 0 : index
    %c2_24 = arith.constant 2 : index
    %91 = vector.load %arg6[%c0_23, %c2_24] : memref<8x4xf32, #tpu.memory_space<vmem>>, vector<8x1xf32>
    %92 = vector.extract_strided_slice %79 {offsets = [2, 0], sizes = [1, 128], strides = [1, 1]} : vector<4x128xf32> to vector<1x128xf32>
    %93 = vector.broadcast %91 : vector<8x1xf32> to vector<8x128xf32>
    %94 = vector.broadcast %92 : vector<1x128xf32> to vector<8x128xf32>
    %95 = arith.mulf %93, %94 : vector<8x128xf32>
    %96 = arith.addf %90, %95 : vector<8x128xf32>
    %c0_25 = arith.constant 0 : index
    %c3_26 = arith.constant 3 : index
    %97 = vector.load %arg6[%c0_25, %c3_26] : memref<8x4xf32, #tpu.memory_space<vmem>>, vector<8x1xf32>
    %98 = vector.extract_strided_slice %79 {offsets = [3, 0], sizes = [1, 128], strides = [1, 1]} : vector<4x128xf32> to vector<1x128xf32>
    %99 = vector.broadcast %97 : vector<8x1xf32> to vector<8x128xf32>
    %100 = vector.broadcast %98 : vector<1x128xf32> to vector<8x128xf32>
    %101 = arith.mulf %99, %100 : vector<8x128xf32>
    %102 = arith.addf %96, %101 : vector<8x128xf32>
    %c0_27 = arith.constant 0 : index
    %c0_28 = arith.constant 0 : index
    %103 = vector.load %arg7[%c0_27, %c0_28] : memref<8x1xf32, #tpu.memory_space<vmem>>, vector<8x1xf32>
    %104 = vector.broadcast %103 : vector<8x1xf32> to vector<8x128xf32>
    %105 = arith.addf %102, %104 : vector<8x128xf32>
    %c0_29 = arith.constant 0 : index
    %c0_30 = arith.constant 0 : index
    %106 = vector.load %arg8[%c0_29, %c0_30] : memref<8x128xf32, #tpu.memory_space<vmem>>, vector<8x128xf32>
    tpu.vector_store %arg8[%c0_29, %c0_30], %105 {strides = array<i32>} : memref<8x128xf32, #tpu.memory_space<vmem>>, vector<8x128xf32>,
    return
  }
  func.func @transform_0(%arg0: i32) -> (i32, i32) {
    %c0_i32 = arith.constant 0 : i32
    %c0_i32_0 = arith.constant 0 : i32
    return %c0_i32, %arg0 : i32, i32
  }
  func.func @transform_1(%arg0: i32) -> (i32, i32) {
    %c0_i32 = arith.constant 0 : i32
    %c0_i32_0 = arith.constant 0 : i32
    %c0_i32_1 = arith.constant 0 : i32
    return %c0_i32, %c0_i32_0 : i32, i32
  }
  func.func @transform_2(%arg0: i32) -> (i32, i32) {
    %c0_i32 = arith.constant 0 : i32
    %c0_i32_0 = arith.constant 0 : i32
    %c0_i32_1 = arith.constant 0 : i32
    return %c0_i32, %c0_i32_0 : i32, i32
  }
  func.func @transform_3(%arg0: i32) -> (i32, i32) {
    %c0_i32 = arith.constant 0 : i32
    %c0_i32_0 = arith.constant 0 : i32
    %c0_i32_1 = arith.constant 0 : i32
    return %c0_i32, %c0_i32_0 : i32, i32
  }
  func.func @transform_4(%arg0: i32) -> (i32, i32) {
    %c0_i32 = arith.constant 0 : i32
    %c0_i32_0 = arith.constant 0 : i32
    %c0_i32_1 = arith.constant 0 : i32
    return %c0_i32, %c0_i32_0 : i32, i32
  }
  func.func @transform_5(%arg0: i32) -> (i32, i32) {
    %c0_i32 = arith.constant 0 : i32
    %c0_i32_0 = arith.constant 0 : i32
    %c0_i32_1 = arith.constant 0 : i32
    return %c0_i32, %c0_i32_0 : i32, i32
  }
  func.func @transform_6(%arg0: i32) -> (i32, i32) {
    %c0_i32 = arith.constant 0 : i32
    %c0_i32_0 = arith.constant 0 : i32
    %c0_i32_1 = arith.constant 0 : i32
    return %c0_i32, %c0_i32_0 : i32, i32
  }
  func.func @transform_7(%arg0: i32) -> (i32, i32) {
    %c0_i32 = arith.constant 0 : i32
    %c0_i32_0 = arith.constant 0 : i32
    return %c0_i32, %arg0 : i32, i32
  }
}

</mosaic_0001>

<bundles_post_ra>
// kernel: tpu_custom_call.1
= control target key start
LH: loop header
LB: loop body
LE: loop exit
PB: predicated region body
PF: predicated region fallthrough
CT: control target
= control target key end

     0   :  { %v287_v1 = vmov 0   ;;  %s377_s0 = inlined_call_operand.vmem [shape: f32[1,128], index: 0, kind: input, shape index: {}]   ;;  %s378_s1 = inlined_call_operand.vmem [shape: f32[4,1], index: 1, kind: input, shape index: {}]   ;;  %s379_s2 = inlined_call_operand.vmem [shape: f32[4,1], index: 2, kind: input, shape index: {}]   ;;  %s380_s3 = inlined_call_operand.vmem [shape: f32[4,4], index: 3, kind: input, shape index: {}]   ;;  %s381_s4 = inlined_call_operand.vmem [shape: f32[4,1], index: 4, kind: input, shape index: {}]   ;;  %s382_s5 = inlined_call_operand.vmem [shape: f32[8,4], index: 5, kind: input, shape index: {}]   ;;  %s383_s6 = inlined_call_operand.vmem [shape: f32[8,1], index: 6, kind: input, shape index: {}]   ;;  %s384_s7 = inlined_call_operand.hbm [shape: f32[8,128], index: 7, kind: output, shape index: {}]  }
   0x1   :  { %v28_v0 = vld [vmem:[%s378_s1] sm:$0xf]  ;;  %235 = vset.pattern.permute.xlu0 %v287_v1  ;;  %236 = vset.pattern.permute.xlu1 %v287_v1 }
   0x2   :  { %v82_v2 = vld [vmem:[%s380_s3] sm:$0xf]  ;;  %31 = vperm.xlu0 %235, %v28_v0  }
   0x3   :  { %85 = vperm.xlu1 %236, %v82_v2  }
   0x4   :  { %12 = vsyncpa [#allocation3], 0  ;;  %v41_v3 = vld [vmem:[%s379_s2] sm:$0xf]  ;;  %v288_v4 = vmov 1   ;;  %v289_v5 = vmov 2   ;;  %v70_v29 = vlaneseq }
   0x5   :  { %v290_v6 = vmov 3   ;;  %v123_v7 = vld [vmem:[%s381_s4] sm:$0xf] }
   0x6   :  { %44 = vperm.xlu0 %235, %v41_v3   ;;  %v164_v8 = vld [vmem:[%s382_s5] sm:$0xff]  ;;  %v353_v30 = vshrl.u32 %v70_v29, 7 }
   0x7   :  { %237 = vset.pattern.permute.xlu1 %v288_v4  ;;  %v205_v9 = vld [vmem:[%s383_s6] sm:$0xff] }
   0x8   :  { %94 = vperm.xlu1 %237, %v82_v2   ;;  %v227_v11 = vld [vmem:[%s377_s0] ss:$0 sm:$0xff]  ;;  %v356_v31 = vsub.s32 0, %v353_v30  ;;  %v99_v39 = vsub.s32 1, %v353_v30  ;;  %v109_v40 = vsub.s32 2, %v353_v30  ;;  %v119_v44 = vsub.s32 3, %v353_v30 }
   0x9   :  { %s291_s0 = smov [#allocation2]  }
   0xa   :  { %238 = vset.pattern.permute.xlu0 %v289_v5  ;;  %s219_s5 = sshll.u32 %s291_s0, 4  ;;  %s220_s5 = int_to_ptr.vmem [resolvable:$true] %s219_s5 }
   0xb   :  { %104 = vperm.xlu0 %238, %v82_v2   ;;  %s263_s6 = scalar_lea.vmem %s220_s5, 128  ;;  %p268_p1 = scmp.lt.s32.totalorder %s220_s5, %s220_s5 }
   0xc   :  { %239 = vset.pattern.permute.xlu1 %v290_v6  ;;  %p264_p0 = scmp.ne.s32.totalorder %s220_s5, %s263_s6  ;;  %p269_p2 = scmp.lt.s32.totalorder %s263_s6, %s263_s6 }
   0xd   :  { %114 = vperm.xlu1 %239, %v82_v2  }
   0xe   :  { %p270_p3 = por %p269_p2, %p268_p1 }
   0xf   :  { %241 = vset.pattern.permute.xlu0 %v287_v1 }
  0x10   :  { %167 = vperm.xlu0 %241, %v164_v8   ;;  %p271_p4 = pnand %p270_p3, %p264_p0 }
  0x11   :  { %240 = vset.pattern.permute.xlu1 %v287_v1 }
  0x12   :  { %126 = vperm.xlu1 %240, %v123_v7  }
  0x14   :  { %244 = vset.pattern.permute.xlu0 %v290_v6 }
  0x15   :  { %196 = vperm.xlu0 %244, %v164_v8  }
  0x16   :  { %242 = vset.pattern.permute.xlu1 %v288_v4 }
  0x17   :  { %176 = vperm.xlu1 %242, %v164_v8  }
  0x19   :  { %246 = vset.pattern.permute.xlu0 %v287_v1 }
  0x1b   :  { %243 = vset.pattern.permute.xlu1 %v289_v5 }
  0x1c   :  { %186 = vperm.xlu1 %243, %v164_v8  }
  0x20   :  { %245 = vset.pattern.permute.xlu1 %v287_v1 }
  0x21   :  { %208 = vperm.xlu1 %245, %v205_v9  }
  0x81   :  { %v32_v10 = vpop.permute.xlu0 %31 }
  0x82   :  { %v40_v12 = vmul.f32 %v227_v11, %v32_v10  ;;  %v86_v38 = vpop.permute.xlu1 %85 }
  0x85   :  { %v45_v13 = vpop.permute.xlu0 %44 }
  0x86   :  { %v47_v14 = vadd.f32 %v45_v13, %v40_v12 }
  0x87   :  { %v95_v42 = vpop.permute.xlu1 %94 }
  0x88   :  { %v48_v15 = vmul.f32 %v47_v14, %v47_v14 }
  0x8a   :  { %v50_v16 = vrot.slane %v48_v15, 1  ;;  %v53_v18 = vrot.slane %v48_v15, 2  ;;  %v56_v20 = vrot.slane %v48_v15, 3  ;;  %v105_v48 = vpop.permute.xlu0 %104 }
  0x8c   :  { %v52_v17 = vadd.f32 %v50_v16, %v48_v15  ;;  %v115_v52 = vpop.permute.xlu1 %114 }
  0x8e   :  { %v55_v19 = vadd.f32 %v53_v18, %v52_v17 }
  0x8f   :  { %v168_v18 = vpop.permute.xlu0 %167 }
  0x90   :  { %v58_v21 = vadd.f32 %v56_v20, %v55_v19 }
  0x91   :  { %v127_v57 = vpop.permute.xlu1 %126 }
  0x92   :  { %247 = vrsqrt.f32 %v58_v21  ;;  %vm61_vm0 = vcmp.eq.f32.partialorder %v58_v21, inf  ;;  %v64_v24 = vand.u32 2147483648, %v58_v21  ;;  %vm63_vm1 = vcmp.eq.f32.partialorder %v58_v21, 0.0 }
  0x96   :  { %v177_v16 = vpop.permute.xlu1 %176 }
  0x9c   :  { %v248_v22 = vpop.eup %247 }
  0x9d   :  { %v60_v23 = vmul.f32 %v248_v22, %v58_v21 }
  0x9f   :  { %v62_v25 = vsel %vm61_vm0, %v58_v21, %v60_v23  ;;  %v187_v23 = vpop.permute.xlu1 %186 }
  0xa0   :  { %v65_v26 = vsel %vm63_vm1, %v64_v24, %v62_v25 }
  0xa1   :  { %v66_v27 = vmul.f32 0.5, %v65_v26 }
  0xa3   :  { %v67_v28 = vadd.f32 1e-08, %v66_v27  ;;  %v197_v27 = vpop.permute.xlu0 %196 }
  0xa5   :  { %249 = vrcp.f32 %v67_v28 }
  0xaf   :  { %v250_v32 = vpop.eup %249 }
  0xb0   :  { %v73_v33 = vrot.slane %v250_v32, %v356_v31 }
  0xb2   :  { %v74_v34 = vmul.f32 %v73_v33, %v47_v14  ;;  %v209_v33 = vpop.permute.xlu1 %208 }
  0xb4   :  { %v228_v35 = vmul.f32 -1.442695, %v74_v34 }
  0xb6   :  { %251 = vpow2.f32 %v228_v35 }
  0xc0   :  { %v252_v36 = vpop.eup %251 }
  0xc1   :  { %v78_v37 = vadd.f32 1.0, %v252_v36 }
  0xc3   :  { %253 = vrcp.f32 %v78_v37 }
  0xcd   :  { %v254_v41 = vpop.eup %253 }
  0xce   :  { %v81_v43 = vmul.f32 %v254_v41, %v74_v34 }
  0xd0   :  { %v91_v45 = vrot.slane %v81_v43, %v356_v31  ;;  %v100_v46 = vrot.slane %v81_v43, %v99_v39  ;;  %v110_v47 = vrot.slane %v81_v43, %v109_v40  ;;  %v120_v51 = vrot.slane %v81_v43, %v119_v44 }
  0xd2   :  { %v92_v49 = vmul.f32 %v91_v45, %v86_v38  ;;  %v101_v50 = vmul.f32 %v100_v46, %v95_v42  ;;  %v111_v54 = vmul.f32 %v110_v47, %v105_v48  ;;  %v121_v55 = vmul.f32 %v120_v51, %v115_v52 }
  0xd4   :  { %v102_v53 = vadd.f32 %v101_v50, %v92_v49 }
  0xd6   :  { %v112_v56 = vadd.f32 %v111_v54, %v102_v53 }
  0xd8   :  { %v122_v58 = vadd.f32 %v121_v55, %v112_v56 }
  0xda   :  { %v129_v59 = vadd.f32 %v127_v57, %v122_v58 }
  0xdc   :  { %v130_v60 = vmul.f32 %v129_v59, %v129_v59 }
  0xde   :  { %v132_v61 = vrot.slane %v130_v60, 1  ;;  %v135_v63 = vrot.slane %v130_v60, 2  ;;  %v138_v1 = vrot.slane %v130_v60, 3 }
  0xe0   :  { %v134_v62 = vadd.f32 %v132_v61, %v130_v60 }
  0xe2   :  { %v137_v0 = vadd.f32 %v135_v63, %v134_v62 }
  0xe4   :  { %v140_v2 = vadd.f32 %v138_v1, %v137_v0 }
  0xe6   :  { %255 = vrsqrt.f32 %v140_v2  ;;  %vm143_vm2 = vcmp.eq.f32.partialorder %v140_v2, inf  ;;  %v146_v5 = vand.u32 2147483648, %v140_v2  ;;  %vm145_vm3 = vcmp.eq.f32.partialorder %v140_v2, 0.0 }
  0xf0   :  { %v256_v3 = vpop.eup %255 }
  0xf1   :  { %v142_v4 = vmul.f32 %v256_v3, %v140_v2 }
  0xf3   :  { %v144_v6 = vsel %vm143_vm2, %v140_v2, %v142_v4 }
  0xf4   :  { %v147_v7 = vsel %vm145_vm3, %v146_v5, %v144_v6 }
  0xf5   :  { %v148_v8 = vmul.f32 0.5, %v147_v7 }
  0xf7   :  { %v149_v9 = vadd.f32 1e-08, %v148_v8 }
  0xf9   :  { %257 = vrcp.f32 %v149_v9 }
 0x103   :  { %v258_v10 = vpop.eup %257 }
 0x104   :  { %v155_v11 = vrot.slane %v258_v10, %v356_v31 }
 0x106   :  { %v156_v12 = vmul.f32 %v155_v11, %v129_v59 }
 0x108   :  { %v229_v13 = vmul.f32 -1.442695, %v156_v12 }
 0x10a   :  { %259 = vpow2.f32 %v229_v13 }
 0x114   :  { %v260_v14 = vpop.eup %259 }
 0x115   :  { %v160_v15 = vadd.f32 1.0, %v260_v14 }
 0x117   :  { %261 = vrcp.f32 %v160_v15 }
 0x121   :  { %v262_v17 = vpop.eup %261 }
 0x122   :  { %v163_v19 = vmul.f32 %v262_v17, %v156_v12 }
 0x124   :  { %v182_v20 = vrot.slane %v163_v19, %v99_v39  ;;  %v173_v21 = vrot.slane %v163_v19, %v356_v31  ;;  %v192_v22 = vrot.slane %v163_v19, %v109_v40  ;;  %v202_v26 = vrot.slane %v163_v19, %v119_v44 }
 0x126   :  { %v183_v24 = vmul.f32 %v182_v20, %v177_v16  ;;  %v174_v25 = vmul.f32 %v173_v21, %v168_v18  ;;  %v193_v29 = vmul.f32 %v192_v22, %v187_v23  ;;  %v203_v32 = vmul.f32 %v202_v26, %v197_v27 }
 0x128   :  { %v184_v28 = vadd.f32 %v183_v24, %v174_v25 }
 0x12a   :  { %v194_v30 = vadd.f32 %v193_v29, %v184_v28 }
 0x12c   :  { %v204_v34 = vadd.f32 %v203_v32, %v194_v30 }
 0x12e   :  { %v211_v35 = vadd.f32 %v209_v33, %v204_v34 }
 0x130   :  { %212 = vst [vmem:[#allocation2] sm:$0xff] %v211_v35 }
 0x131   :  { %274 = shalt.err (!%p271_p4)
}
 0x132   :  { %s275_s13 = scalar_lea.hbm %s384_s7, 128 }
 0x133   :  { %p276_p5 = scmp.ne.s32.totalorder %s384_s7, %s275_s13  ;;  %p279_p6 = scmp.lt.u32.totalorder %s275_s13, %s384_s7 }
 0x135   :  { %p281_p7 = pnand %p279_p6, %p276_p5 }
 0x137   :  { %284 = shalt.err (!%p281_p7)
}
 0x138   :  { %222 = dma.vmem_to_hbm [thread:$0]  %s220_s5, 128, %s384_s7, [#allocation3]  }
 0x139   :  { %285 = dma.done.wait [#allocation3], 128  }
 0x13a   :  { %286 = vsyncadd [#allocation3], 4294967168 }
 0x13b   :  { %226 = vsyncpa [#allocation3], 1 }

</bundles_post_ra>
